<compile_context>
chip_gen: v6e
topology: v6e:2x2x1
jax: 0.10.0
libtpu: 0.0.40
codegen_flags: <defaults>
</compile_context>

<pallas_src>
import functools

import jax
import jax.numpy as jnp
from jax import lax
from jax.experimental import pallas as pl
from jax.experimental.pallas import tpu as pltpu

LN_EPS = 1e-5  # PyTorch nn.LayerNorm default


def _layer_norm_f32(x, gamma, beta):
    """LayerNorm over the last axis in f32 (matches PyTorch semantics)."""
    mu = jnp.mean(x, axis=-1, keepdims=True)
    var = jnp.mean((x - mu) ** 2, axis=-1, keepdims=True)
    return (x - mu) * lax.rsqrt(var + LN_EPS) * gamma + beta


# ---------------------------------------------------------------------------
# Fused kernel:  x = x + proj(attn(LN1(x)));  x = x + FFN(LN2(x))
# One grid step processes `batch_block` full batch rows.
# ---------------------------------------------------------------------------
def _block_kernel(x_ref, g1_ref, b1_ref, wq_ref, wk_ref, wv_ref, wp_ref, bp_ref,
                  g2_ref, b2_ref, w1_ref, fb1_ref, w2_ref, fb2_ref, o_ref,
                  *, num_heads, head_size, batch_block, seq_len, compute_dtype):
    Bblk, T, hs, nh = batch_block, seq_len, head_size, num_heads
    E = nh * hs
    M = Bblk * T

    # ---- LN1 (f32) over all rows of this batch block ----------------------
    x = x_ref[...].reshape(M, E).astype(jnp.float32)
    xn = _layer_norm_f32(x, g1_ref[...], b1_ref[...])
    xn_c = xn.astype(compute_dtype)

    # ---- fused QKV projections: one wide matmul each (all heads at once) ---
    q = jnp.dot(xn_c, wq_ref[...], preferred_element_type=jnp.float32)   # (M, nh*hs)
    k = jnp.dot(xn_c, wk_ref[...], preferred_element_type=jnp.float32)
    v = jnp.dot(xn_c, wv_ref[...], preferred_element_type=jnp.float32)

    # Causal mask of the module: score[i, j] = k_i . q_j kept where q-pos j <= k-pos i
    ki = lax.broadcasted_iota(jnp.int32, (Bblk, T, T), 1)
    qj = lax.broadcasted_iota(jnp.int32, (Bblk, T, T), 2)
    causal = qj <= ki
    scale = float(hs) ** -0.5

    head_outs = []
    for h in range(nh):                                    # small static unroll
        sl = slice(h * hs, (h + 1) * hs)
        qh = q[:, sl].reshape(Bblk, T, hs)
        kh = k[:, sl].reshape(Bblk, T, hs)
        vh = v[:, sl].reshape(Bblk, T, hs)
        # NOTE: the reference module computes k @ q^T (not q @ k^T); keep it.
        s = lax.dot_general(kh, qh, (((2,), (2,)), ((0,), (0,))),
                            preferred_element_type=jnp.float32)           # (Bblk,T,T)
        s = jnp.where(causal, s, -jnp.inf) * scale          # mask-then-scale, as in module
        s = s - jnp.max(s, axis=-1, keepdims=True)
        e = jnp.exp(s)
        p = e * pl.reciprocal(jnp.sum(e, axis=-1, keepdims=True), approx=True)
        ho = lax.dot_general(p, vh, (((2,), (1,)), ((0,), (0,))),
                             preferred_element_type=jnp.float32)           # (Bblk,T,hs)
        head_outs.append(ho.reshape(M, hs))
    att = jnp.concatenate(head_outs, axis=-1)               # (M, nh*hs), head-concat order

    # ---- single fused output projection + residual -------------------------
    x1 = x + jnp.dot(att.astype(compute_dtype), wp_ref[...],
                     preferred_element_type=jnp.float32) + bp_ref[...]

    # ---- LN2 + FeedForward + residual (fused; hidden fits in one tile) -----
    xn2 = _layer_norm_f32(x1, g2_ref[...], b2_ref[...])
    h1 = jnp.dot(xn2.astype(compute_dtype), w1_ref[...],
                 preferred_element_type=jnp.float32) + fb1_ref[...]
    h1 = jnp.maximum(h1, 0.0)
    y = x1 + jnp.dot(h1.astype(compute_dtype), w2_ref[...],
                     preferred_element_type=jnp.float32) + fb2_ref[...]

    o_ref[...] = y.reshape(Bblk, T, E).astype(o_ref.dtype)
    # TODO(synk): nn.Dropout with p>0 (training) has no path here; p=0.0 is identity.
    # TODO(synk): E=32 < 128 lanes -> stores are masked vst.msk; a lane-dense
    #             (M,32)->(M/4,128) fold needs an in-kernel relayout (skipped for
    #             lowering robustness at these tiny shapes).
    # TODO(synk): for long sequences, replace the O(T^2) per-block scores with a
    #             flash-style (q-tile x kv-tile) grid; module block_size=8 here.


# ---------------------------------------------------------------------------
# Wrapper
# ---------------------------------------------------------------------------
def transformer_block(x, params, *, compute_dtype=jnp.bfloat16, batch_block=None):
    """Forward pass of `Block` on x: [B, T, E] -> [B, T, E]."""
    (g1, b_ln1, wq, wk, wv, wp, bp, g2, b_ln2, w1, b1, w2, b2) = params
    B, T, E = x.shape
    nh, _, hs = wq.shape
    C = nh * hs                      # == E for this module
    hidden = w1.shape[1]

    # Batch block: stack rows to amortize per-step overhead and fill MXU rows,
    # but keep >= 2 parallel grid steps when B >= 2 (feeds both v7x TCs).
    if batch_block is None:
        cap = max(1, 256 // max(T, 1))                 # <= ~256 rows per grid step
        batch_block = min(cap, B if B < 2 else max(1, B // 2))
    batch_block = max(1, min(batch_block, B))
    while B % batch_block != 0:                        # grid must tile B exactly
        batch_block -= 1
    grid_b = B // batch_block

    # Fuse per-head weights into single wide matmuls (done once, outside the kernel).
    wq_f = jnp.transpose(wq, (1, 0, 2)).reshape(E, C).astype(compute_dtype)
    wk_f = jnp.transpose(wk, (1, 0, 2)).reshape(E, C).astype(compute_dtype)
    wv_f = jnp.transpose(wv, (1, 0, 2)).reshape(E, C).astype(compute_dtype)
    wp_f = wp.astype(compute_dtype)                    # (C, E), already concat-ordered
    w1_c = w1.astype(compute_dtype)
    w2_c = w2.astype(compute_dtype)

    itemsize = jnp.dtype(compute_dtype).itemsize
    cost = pl.CostEstimate(
        flops=(2 * B * T * E * 3 * C                   # fused QKV
               + 4 * B * nh * T * T * hs               # scores + P @ V
               + 2 * B * T * C * E                     # output projection
               + 4 * B * T * E * hidden                # FFN matmuls
               + 24 * B * T * E),                      # LN / softmax / residual elementwise
        transcendentals=B * nh * T * T + 2 * B * T,
        bytes_accessed=(2 * B * T * E * x.dtype.itemsize
                        + (3 * E * C + C * E + 2 * E * hidden) * itemsize
                        + (6 * E + hidden) * 4),
    )

    const2 = lambda b: (0, 0)

    out = pl.pallas_call(
        functools.partial(_block_kernel, num_heads=nh, head_size=hs,
                          batch_block=batch_block, seq_len=T,
                          compute_dtype=compute_dtype),
        out_shape=jax.ShapeDtypeStruct((B, T, E), x.dtype),
        grid_spec=pltpu.PrefetchScalarGridSpec(
            num_scalar_prefetch=0,
            grid=(grid_b,),
            in_specs=[
                pl.BlockSpec((batch_block, T, E), lambda b: (b, 0, 0)),  # x
                pl.BlockSpec((1, E), const2),          # LN1 gamma
                pl.BlockSpec((1, E), const2),          # LN1 beta
                pl.BlockSpec((E, C), const2),          # Wq (heads fused)
                pl.BlockSpec((E, C), const2),          # Wk
                pl.BlockSpec((E, C), const2),          # Wv
                pl.BlockSpec((C, E), const2),          # Wproj
                pl.BlockSpec((1, E), const2),          # bproj
                pl.BlockSpec((1, E), const2),          # LN2 gamma
                pl.BlockSpec((1, E), const2),          # LN2 beta
                pl.BlockSpec((E, hidden), const2),     # W1
                pl.BlockSpec((1, hidden), const2),     # b1
                pl.BlockSpec((hidden, E), const2),     # W2
                pl.BlockSpec((1, E), const2),          # b2
            ],
            out_specs=pl.BlockSpec((batch_block, T, E), lambda b: (b, 0, 0)),
        ),
        compiler_params=pltpu.CompilerParams(
            dimension_semantics=("parallel",),
            vmem_limit_bytes=32 * 1024 * 1024,   # explicit budget; safe on v5e/v6e/v7x
        ),
        cost_estimate=cost,
    )(x,
      g1.reshape(1, E).astype(jnp.float32),
      b_ln1.reshape(1, E).astype(jnp.float32),
      wq_f, wk_f, wv_f, wp_f,
      bp.reshape(1, E).astype(jnp.float32),
      g2.reshape(1, E).astype(jnp.float32),
      b_ln2.reshape(1, E).astype(jnp.float32),
      w1_c,
      b1.reshape(1, hidden).astype(jnp.float32),
      w2_c,
      b2.reshape(1, E).astype(jnp.float32))
    return out


# ---------------------------------------------------------------------------
# Parameters and pure-JAX reference (mirrors the PyTorch module, dropout p=0.0)
# ---------------------------------------------------------------------------
def init_params(key, embedding_n=32, num_heads=4, dtype=jnp.float32):
    head_size = embedding_n // num_heads
    hidden = 4 * embedding_n
    ks = jax.random.split(key, 13)
    u = jax.random.uniform
    lim_e = 1.0 / embedding_n ** 0.5
    lim_p = 1.0 / (num_heads * head_size) ** 0.5
    lim_h = 1.0 / hidden ** 0.5
    wq = u(ks[0], (num_heads, embedding_n, head_size), dtype, -lim_e, lim_e)
    wk = u(ks[1], (num_heads, embedding_n, head_size), dtype, -lim_e, lim_e)
    wv = u(ks[2], (num_heads, embedding_n, head_size), dtype, -lim_e, lim_e)
    wp = u(ks[3], (num_heads * head_size, embedding_n), dtype, -lim_p, lim_p)
    bp = u(ks[4], (embedding_n,), dtype, -lim_p, lim_p)
    w1 = u(ks[5], (embedding_n, hidden), dtype, -lim_e, lim_e)
    b1 = u(ks[6], (hidden,), dtype, -lim_e, lim_e)
    w2 = u(ks[7], (hidden, embedding_n), dtype, -lim_h, lim_h)
    b2 = u(ks[8], (embedding_n,), dtype, -lim_h, lim_h)
    g1 = 1.0 + 0.05 * jax.random.normal(ks[9], (embedding_n,), dtype)
    b_ln1 = 0.05 * jax.random.normal(ks[10], (embedding_n,), dtype)
    g2 = 1.0 + 0.05 * jax.random.normal(ks[11], (embedding_n,), dtype)
    b_ln2 = 0.05 * jax.random.normal(ks[12], (embedding_n,), dtype)
    return (g1, b_ln1, wq, wk, wv, wp, bp, g2, b_ln2, w1, b1, w2, b2)


def block_reference(x, params):
    (g1, b_ln1, wq, wk, wv, wp, bp, g2, b_ln2, w1, b1, w2, b2) = params
    P = lax.Precision.HIGHEST
    B, T, E = x.shape
    nh, _, hs = wq.shape
    xn = _layer_norm_f32(x, g1, b_ln1)
    heads = []
    mask = jnp.arange(T)[None, :] <= jnp.arange(T)[:, None]
    for h in range(nh):
        q = jnp.einsum("bte,ed->btd", xn, wq[h], precision=P)
        k = jnp.einsum("bte,ed->btd", xn, wk[h], precision=P)
        v = jnp.einsum("bte,ed->btd", xn, wv[h], precision=P)
        s = jnp.einsum("bid,bjd->bij", k, q, precision=P)     # k @ q^T, as in module
        s = jnp.where(mask[None], s, -jnp.inf) * (hs ** -0.5)
        s = s - jnp.max(s, axis=-1, keepdims=True)
        p = jnp.exp(s)
        p = p / jnp.sum(p, axis=-1, keepdims=True)
        heads.append(jnp.einsum("bij,bjd->bid", p, v, precision=P))
    att = jnp.concatenate(heads, axis=-1)
    x = x + jnp.einsum("btk,ke->bte", att, wp, precision=P) + bp
    xn2 = _layer_norm_f32(x, g2, b_ln2)
    h1 = jnp.maximum(jnp.einsum("bte,eh->bth", xn2, w1, precision=P) + b1, 0.0)
    y = jnp.einsum("bth,he->bte", h1, w2, precision=P) + b2
    return x + y


if __name__ == "__main__":
    key = jax.random.PRNGKey(0)
    kx, kp = jax.random.split(key)

    batch, seq, embedding_n, num_heads = 2, 8, 32, 4
    x = jax.random.normal(kx, (batch, seq, embedding_n), dtype=jnp.float32)
    params = init_params(kp, embedding_n=embedding_n, num_heads=num_heads)

    ref = block_reference(x, params)

    # Exact-semantics path: f32 MXU operands everywhere.
    y32 = jax.block_until_ready(
        transformer_block(x, params, compute_dtype=jnp.float32))
    assert y32.shape == x.shape
    assert jnp.allclose(y32, ref, atol=1e-2, rtol=1e-2)

    # Default fast path: bf16 MXU operands, f32 accumulation, f32 LN/softmax.
    ybf = jax.block_until_ready(
        transformer_block(x, params, compute_dtype=jnp.bfloat16))
    assert ybf.shape == x.shape
    assert jnp.allclose(ybf, ref, atol=8e-2, rtol=8e-2)

    print("KERNEL_OK")
</pallas_src>

<mosaic_0001>
module attributes {stable_mosaic.version = 11 : i64} {
  func.func @_block_kernel(%arg0: i32, %arg1: memref<1x8x32xf32, #tpu.memory_space<vmem>>, %arg2: memref<1x32xf32, #tpu.memory_space<vmem>>, %arg3: memref<1x32xf32, #tpu.memory_space<vmem>>, %arg4: memref<32x32xf32, #tpu.memory_space<vmem>>, %arg5: memref<32x32xf32, #tpu.memory_space<vmem>>, %arg6: memref<32x32xf32, #tpu.memory_space<vmem>>, %arg7: memref<32x32xf32, #tpu.memory_space<vmem>>, %arg8: memref<1x32xf32, #tpu.memory_space<vmem>>, %arg9: memref<1x32xf32, #tpu.memory_space<vmem>>, %arg10: memref<1x32xf32, #tpu.memory_space<vmem>>, %arg11: memref<32x128xf32, #tpu.memory_space<vmem>>, %arg12: memref<1x128xf32, #tpu.memory_space<vmem>>, %arg13: memref<128x32xf32, #tpu.memory_space<vmem>>, %arg14: memref<1x32xf32, #tpu.memory_space<vmem>>, %arg15: memref<1x8x32xf32, #tpu.memory_space<vmem>>) attributes {dimension_semantics = [#tpu.dimension_semantics<parallel>], iteration_bounds = array<i64: 2>, scalar_prefetch = 0 : i64, scratch_operands = 0 : i64, tpu.core_type = #tpu.core_type<tc>, window_params = [{transform_indices = @transform_0, window_bounds = array<i64: 1, 8, 32>}, {pipeline_mode = #tpu.pipeline_mode<synchronous>, transform_indices = @transform_1, window_bounds = array<i64: 1, 32>}, {pipeline_mode = #tpu.pipeline_mode<synchronous>, transform_indices = @transform_2, window_bounds = array<i64: 1, 32>}, {pipeline_mode = #tpu.pipeline_mode<synchronous>, transform_indices = @transform_3, window_bounds = array<i64: 32, 32>}, {pipeline_mode = #tpu.pipeline_mode<synchronous>, transform_indices = @transform_4, window_bounds = array<i64: 32, 32>}, {pipeline_mode = #tpu.pipeline_mode<synchronous>, transform_indices = @transform_5, window_bounds = array<i64: 32, 32>}, {pipeline_mode = #tpu.pipeline_mode<synchronous>, transform_indices = @transform_6, window_bounds = array<i64: 32, 32>}, {pipeline_mode = #tpu.pipeline_mode<synchronous>, transform_indices = @transform_7, window_bounds = array<i64: 1, 32>}, {pipeline_mode = #tpu.pipeline_mode<synchronous>, transform_indices = @transform_8, window_bounds = array<i64: 1, 32>}, {pipeline_mode = #tpu.pipeline_mode<synchronous>, transform_indices = @transform_9, window_bounds = array<i64: 1, 32>}, {pipeline_mode = #tpu.pipeline_mode<synchronous>, transform_indices = @transform_10, window_bounds = array<i64: 32, 128>}, {pipeline_mode = #tpu.pipeline_mode<synchronous>, transform_indices = @transform_11, window_bounds = array<i64: 1, 128>}, {pipeline_mode = #tpu.pipeline_mode<synchronous>, transform_indices = @transform_12, window_bounds = array<i64: 128, 32>}, {pipeline_mode = #tpu.pipeline_mode<synchronous>, transform_indices = @transform_13, window_bounds = array<i64: 1, 32>}, {transform_indices = @transform_14, window_bounds = array<i64: 1, 8, 32>}]} {
    %c0 = arith.constant 0 : index
    %c0_0 = arith.constant 0 : index
    %c0_1 = arith.constant 0 : index
    %0 = vector.load %arg1[%c0, %c0_0, %c0_1] : memref<1x8x32xf32, #tpu.memory_space<vmem>>, vector<1x8x32xf32>
    %1 = vector.shape_cast %0 : vector<1x8x32xf32> to vector<8x32xf32>
    %c0_2 = arith.constant 0 : index
    %c0_3 = arith.constant 0 : index
    %2 = vector.load %arg2[%c0_2, %c0_3] : memref<1x32xf32, #tpu.memory_space<vmem>>, vector<1x32xf32>
    %c0_4 = arith.constant 0 : index
    %c0_5 = arith.constant 0 : index
    %3 = vector.load %arg3[%c0_4, %c0_5] : memref<1x32xf32, #tpu.memory_space<vmem>>, vector<1x32xf32>
    %cst = arith.constant dense<0.000000e+00> : vector<8xf32>
    %4 = vector.multi_reduction <add>, %1, %cst [1] : vector<8x32xf32> to vector<8xf32>
    %5 = vector.shape_cast %4 : vector<8xf32> to vector<8x1xf32>
    %cst_6 = arith.constant 3.200000e+01 : f32
    %6 = vector.broadcast %cst_6 : f32 to vector<8x1xf32>
    %7 = arith.divf %5, %6 : vector<8x1xf32>
    %8 = vector.broadcast %7 : vector<8x1xf32> to vector<8x32xf32>
    %9 = arith.subf %1, %8 : vector<8x32xf32>
    %10 = arith.mulf %9, %9 : vector<8x32xf32>
    %cst_7 = arith.constant dense<0.000000e+00> : vector<8xf32>
    %11 = vector.multi_reduction <add>, %10, %cst_7 [1] : vector<8x32xf32> to vector<8xf32>
    %12 = vector.shape_cast %11 : vector<8xf32> to vector<8x1xf32>
    %cst_8 = arith.constant 3.200000e+01 : f32
    %13 = vector.broadcast %cst_8 : f32 to vector<8x1xf32>
    %14 = arith.divf %12, %13 : vector<8x1xf32>
    %15 = vector.broadcast %7 : vector<8x1xf32> to vector<8x32xf32>
    %16 = arith.subf %1, %15 : vector<8x32xf32>
    %cst_9 = arith.constant 9.99999974E-6 : f32
    %17 = vector.broadcast %cst_9 : f32 to vector<8x1xf32>
    %18 = arith.addf %14, %17 : vector<8x1xf32>
    %19 = math.rsqrt %18 : vector<8x1xf32>
    %20 = vector.broadcast %19 : vector<8x1xf32> to vector<8x32xf32>
    %21 = arith.mulf %16, %20 : vector<8x32xf32>
    %22 = vector.broadcast %2 : vector<1x32xf32> to vector<8x32xf32>
    %23 = arith.mulf %21, %22 : vector<8x32xf32>
    %24 = vector.broadcast %3 : vector<1x32xf32> to vector<8x32xf32>
    %25 = arith.addf %23, %24 : vector<8x32xf32>
    %c0_10 = arith.constant 0 : index
    %c0_11 = arith.constant 0 : index
    %26 = vector.load %arg4[%c0_10, %c0_11] : memref<32x32xf32, #tpu.memory_space<vmem>>, vector<32x32xf32>
    %cst_12 = arith.constant dense<0.000000e+00> : vector<8x32xf32>
    %27 = tpu.matmul %25, %26, %cst_12 {dimension_numbers = #tpu.dot_dimension_numbers<[1], [0], [0], [1], [0, 0, 1, 1], [], []>} : vector<8x32xf32>, vector<32x32xf32>, vector<8x32xf32> -> vector<8x32xf32>
    %c0_13 = arith.constant 0 : index
    %c0_14 = arith.constant 0 : index
    %28 = vector.load %arg5[%c0_13, %c0_14] : memref<32x32xf32, #tpu.memory_space<vmem>>, vector<32x32xf32>
    %cst_15 = arith.constant dense<0.000000e+00> : vector<8x32xf32>
    %29 = tpu.matmul %25, %28, %cst_15 {dimension_numbers = #tpu.dot_dimension_numbers<[1], [0], [0], [1], [0, 0, 1, 1], [], []>} : vector<8x32xf32>, vector<32x32xf32>, vector<8x32xf32> -> vector<8x32xf32>
    %c0_16 = arith.constant 0 : index
    %c0_17 = arith.constant 0 : index
    %30 = vector.load %arg6[%c0_16, %c0_17] : memref<32x32xf32, #tpu.memory_space<vmem>>, vector<32x32xf32>
    %cst_18 = arith.constant dense<0.000000e+00> : vector<8x32xf32>
    %31 = tpu.matmul %25, %30, %cst_18 {dimension_numbers = #tpu.dot_dimension_numbers<[1], [0], [0], [1], [0, 0, 1, 1], [], []>} : vector<8x32xf32>, vector<32x32xf32>, vector<8x32xf32> -> vector<8x32xf32>
    %32 = tpu.iota {dimensions = array<i32: 1>} : vector<1x8x8xi32>
    %33 = tpu.iota {dimensions = array<i32: 2>} : vector<1x8x8xi32>
    %34 = arith.cmpi sle, %33, %32 : vector<1x8x8xi32>
    %35 = vector.extract_strided_slice %27 {offsets = [0, 0], sizes = [8, 8], strides = [1, 1]} : vector<8x32xf32> to vector<8x8xf32>
    %36 = vector.shape_cast %35 : vector<8x8xf32> to vector<1x8x8xf32>
    %37 = vector.extract_strided_slice %29 {offsets = [0, 0], sizes = [8, 8], strides = [1, 1]} : vector<8x32xf32> to vector<8x8xf32>
    %38 = vector.shape_cast %37 : vector<8x8xf32> to vector<1x8x8xf32>
    %39 = vector.extract_strided_slice %31 {offsets = [0, 0], sizes = [8, 8], strides = [1, 1]} : vector<8x32xf32> to vector<8x8xf32>
    %40 = vector.shape_cast %39 : vector<8x8xf32> to vector<1x8x8xf32>
    %cst_19 = arith.constant dense<0.000000e+00> : vector<1x8x8xf32>
    %41 = tpu.matmul %38, %36, %cst_19 {dimension_numbers = #tpu.dot_dimension_numbers<[2], [2], [1], [1], [0, 0, 0, 1, 1, 1], [0], [0]>} : vector<1x8x8xf32>, vector<1x8x8xf32>, vector<1x8x8xf32> -> vector<1x8x8xf32>
    %cst_20 = arith.constant 0xFF800000 : f32
    %42 = vector.broadcast %cst_20 : f32 to vector<1x8x8xf32>
    %43 = arith.select %34, %41, %42 : vector<1x8x8xi1>, vector<1x8x8xf32>
    %cst_21 = arith.constant 0.353553385 : f32
    %44 = vector.broadcast %cst_21 : f32 to vector<1x8x8xf32>
    %45 = arith.mulf %43, %44 : vector<1x8x8xf32>
    %cst_22 = arith.constant dense<0xFF800000> : vector<1x8xf32>
    %46 = vector.multi_reduction <maximumf>, %45, %cst_22 [2] : vector<1x8x8xf32> to vector<1x8xf32>
    %47 = vector.shape_cast %46 : vector<1x8xf32> to vector<1x8x1xf32>
    %48 = vector.broadcast %47 : vector<1x8x1xf32> to vector<1x8x8xf32>
    %49 = arith.subf %45, %48 : vector<1x8x8xf32>
    %50 = math.exp %49 : vector<1x8x8xf32>
    %cst_23 = arith.constant dense<0.000000e+00> : vector<1x8xf32>
    %51 = vector.multi_reduction <add>, %50, %cst_23 [2] : vector<1x8x8xf32> to vector<1x8xf32>
    %52 = vector.shape_cast %51 : vector<1x8xf32> to vector<1x8x1xf32>
    %53 = tpu.reciprocal %52 {approx = true} : vector<1x8x1xf32> -> vector<1x8x1xf32>
    %54 = vector.broadcast %53 : vector<1x8x1xf32> to vector<1x8x8xf32>
    %55 = arith.mulf %50, %54 : vector<1x8x8xf32>
    %cst_24 = arith.constant dense<0.000000e+00> : vector<1x8x8xf32>
    %56 = tpu.matmul %55, %40, %cst_24 {dimension_numbers = #tpu.dot_dimension_numbers<[2], [1], [1], [2], [0, 0, 0, 1, 1, 2], [0], [0]>} : vector<1x8x8xf32>, vector<1x8x8xf32>, vector<1x8x8xf32> -> vector<1x8x8xf32>
    %57 = vector.shape_cast %56 : vector<1x8x8xf32> to vector<8x8xf32>
    %58 = vector.extract_strided_slice %27 {offsets = [0, 8], sizes = [8, 8], strides = [1, 1]} : vector<8x32xf32> to vector<8x8xf32>
    %59 = vector.shape_cast %58 : vector<8x8xf32> to vector<1x8x8xf32>
    %60 = vector.extract_strided_slice %29 {offsets = [0, 8], sizes = [8, 8], strides = [1, 1]} : vector<8x32xf32> to vector<8x8xf32>
    %61 = vector.shape_cast %60 : vector<8x8xf32> to vector<1x8x8xf32>
    %62 = vector.extract_strided_slice %31 {offsets = [0, 8], sizes = [8, 8], strides = [1, 1]} : vector<8x32xf32> to vector<8x8xf32>
    %63 = vector.shape_cast %62 : vector<8x8xf32> to vector<1x8x8xf32>
    %cst_25 = arith.constant dense<0.000000e+00> : vector<1x8x8xf32>
    %64 = tpu.matmul %61, %59, %cst_25 {dimension_numbers = #tpu.dot_dimension_numbers<[2], [2], [1], [1], [0, 0, 0, 1, 1, 1], [0], [0]>} : vector<1x8x8xf32>, vector<1x8x8xf32>, vector<1x8x8xf32> -> vector<1x8x8xf32>
    %cst_26 = arith.constant 0xFF800000 : f32
    %65 = vector.broadcast %cst_26 : f32 to vector<1x8x8xf32>
    %66 = arith.select %34, %64, %65 : vector<1x8x8xi1>, vector<1x8x8xf32>
    %cst_27 = arith.constant 0.353553385 : f32
    %67 = vector.broadcast %cst_27 : f32 to vector<1x8x8xf32>
    %68 = arith.mulf %66, %67 : vector<1x8x8xf32>
    %cst_28 = arith.constant dense<0xFF800000> : vector<1x8xf32>
    %69 = vector.multi_reduction <maximumf>, %68, %cst_28 [2] : vector<1x8x8xf32> to vector<1x8xf32>
    %70 = vector.shape_cast %69 : vector<1x8xf32> to vector<1x8x1xf32>
    %71 = vector.broadcast %70 : vector<1x8x1xf32> to vector<1x8x8xf32>
    %72 = arith.subf %68, %71 : vector<1x8x8xf32>
    %73 = math.exp %72 : vector<1x8x8xf32>
    %cst_29 = arith.constant dense<0.000000e+00> : vector<1x8xf32>
    %74 = vector.multi_reduction <add>, %73, %cst_29 [2] : vector<1x8x8xf32> to vector<1x8xf32>
    %75 = vector.shape_cast %74 : vector<1x8xf32> to vector<1x8x1xf32>
    %76 = tpu.reciprocal %75 {approx = true} : vector<1x8x1xf32> -> vector<1x8x1xf32>
    %77 = vector.broadcast %76 : vector<1x8x1xf32> to vector<1x8x8xf32>
    %78 = arith.mulf %73, %77 : vector<1x8x8xf32>
    %cst_30 = arith.constant dense<0.000000e+00> : vector<1x8x8xf32>
    %79 = tpu.matmul %78, %63, %cst_30 {dimension_numbers = #tpu.dot_dimension_numbers<[2], [1], [1], [2], [0, 0, 0, 1, 1, 2], [0], [0]>} : vector<1x8x8xf32>, vector<1x8x8xf32>, vector<1x8x8xf32> -> vector<1x8x8xf32>
    %80 = vector.shape_cast %79 : vector<1x8x8xf32> to vector<8x8xf32>
    %81 = vector.extract_strided_slice %27 {offsets = [0, 16], sizes = [8, 8], strides = [1, 1]} : vector<8x32xf32> to vector<8x8xf32>
    %82 = vector.shape_cast %81 : vector<8x8xf32> to vector<1x8x8xf32>
    %83 = vector.extract_strided_slice %29 {offsets = [0, 16], sizes = [8, 8], strides = [1, 1]} : vector<8x32xf32> to vector<8x8xf32>
    %84 = vector.shape_cast %83 : vector<8x8xf32> to vector<1x8x8xf32>
    %85 = vector.extract_strided_slice %31 {offsets = [0, 16], sizes = [8, 8], strides = [1, 1]} : vector<8x32xf32> to vector<8x8xf32>
    %86 = vector.shape_cast %85 : vector<8x8xf32> to vector<1x8x8xf32>
    %cst_31 = arith.constant dense<0.000000e+00> : vector<1x8x8xf32>
    %87 = tpu.matmul %84, %82, %cst_31 {dimension_numbers = #tpu.dot_dimension_numbers<[2], [2], [1], [1], [0, 0, 0, 1, 1, 1], [0], [0]>} : vector<1x8x8xf32>, vector<1x8x8xf32>, vector<1x8x8xf32> -> vector<1x8x8xf32>
    %cst_32 = arith.constant 0xFF800000 : f32
    %88 = vector.broadcast %cst_32 : f32 to vector<1x8x8xf32>
    %89 = arith.select %34, %87, %88 : vector<1x8x8xi1>, vector<1x8x8xf32>
    %cst_33 = arith.constant 0.353553385 : f32
    %90 = vector.broadcast %cst_33 : f32 to vector<1x8x8xf32>
    %91 = arith.mulf %89, %90 : vector<1x8x8xf32>
    %cst_34 = arith.constant dense<0xFF800000> : vector<1x8xf32>
    %92 = vector.multi_reduction <maximumf>, %91, %cst_34 [2] : vector<1x8x8xf32> to vector<1x8xf32>
    %93 = vector.shape_cast %92 : vector<1x8xf32> to vector<1x8x1xf32>
    %94 = vector.broadcast %93 : vector<1x8x1xf32> to vector<1x8x8xf32>
    %95 = arith.subf %91, %94 : vector<1x8x8xf32>
    %96 = math.exp %95 : vector<1x8x8xf32>
    %cst_35 = arith.constant dense<0.000000e+00> : vector<1x8xf32>
    %97 = vector.multi_reduction <add>, %96, %cst_35 [2] : vector<1x8x8xf32> to vector<1x8xf32>
    %98 = vector.shape_cast %97 : vector<1x8xf32> to vector<1x8x1xf32>
    %99 = tpu.reciprocal %98 {approx = true} : vector<1x8x1xf32> -> vector<1x8x1xf32>
    %100 = vector.broadcast %99 : vector<1x8x1xf32> to vector<1x8x8xf32>
    %101 = arith.mulf %96, %100 : vector<1x8x8xf32>
    %cst_36 = arith.constant dense<0.000000e+00> : vector<1x8x8xf32>
    %102 = tpu.matmul %101, %86, %cst_36 {dimension_numbers = #tpu.dot_dimension_numbers<[2], [1], [1], [2], [0, 0, 0, 1, 1, 2], [0], [0]>} : vector<1x8x8xf32>, vector<1x8x8xf32>, vector<1x8x8xf32> -> vector<1x8x8xf32>
    %103 = vector.shape_cast %102 : vector<1x8x8xf32> to vector<8x8xf32>
    %104 = vector.extract_strided_slice %27 {offsets = [0, 24], sizes = [8, 8], strides = [1, 1]} : vector<8x32xf32> to vector<8x8xf32>
    %105 = vector.shape_cast %104 : vector<8x8xf32> to vector<1x8x8xf32>
    %106 = vector.extract_strided_slice %29 {offsets = [0, 24], sizes = [8, 8], strides = [1, 1]} : vector<8x32xf32> to vector<8x8xf32>
    %107 = vector.shape_cast %106 : vector<8x8xf32> to vector<1x8x8xf32>
    %108 = vector.extract_strided_slice %31 {offsets = [0, 24], sizes = [8, 8], strides = [1, 1]} : vector<8x32xf32> to vector<8x8xf32>
    %109 = vector.shape_cast %108 : vector<8x8xf32> to vector<1x8x8xf32>
    %cst_37 = arith.constant dense<0.000000e+00> : vector<1x8x8xf32>
    %110 = tpu.matmul %107, %105, %cst_37 {dimension_numbers = #tpu.dot_dimension_numbers<[2], [2], [1], [1], [0, 0, 0, 1, 1, 1], [0], [0]>} : vector<1x8x8xf32>, vector<1x8x8xf32>, vector<1x8x8xf32> -> vector<1x8x8xf32>
    %cst_38 = arith.constant 0xFF800000 : f32
    %111 = vector.broadcast %cst_38 : f32 to vector<1x8x8xf32>
    %112 = arith.select %34, %110, %111 : vector<1x8x8xi1>, vector<1x8x8xf32>
    %cst_39 = arith.constant 0.353553385 : f32
    %113 = vector.broadcast %cst_39 : f32 to vector<1x8x8xf32>
    %114 = arith.mulf %112, %113 : vector<1x8x8xf32>
    %cst_40 = arith.constant dense<0xFF800000> : vector<1x8xf32>
    %115 = vector.multi_reduction <maximumf>, %114, %cst_40 [2] : vector<1x8x8xf32> to vector<1x8xf32>
    %116 = vector.shape_cast %115 : vector<1x8xf32> to vector<1x8x1xf32>
    %117 = vector.broadcast %116 : vector<1x8x1xf32> to vector<1x8x8xf32>
    %118 = arith.subf %114, %117 : vector<1x8x8xf32>
    %119 = math.exp %118 : vector<1x8x8xf32>
    %cst_41 = arith.constant dense<0.000000e+00> : vector<1x8xf32>
    %120 = vector.multi_reduction <add>, %119, %cst_41 [2] : vector<1x8x8xf32> to vector<1x8xf32>
    %121 = vector.shape_cast %120 : vector<1x8xf32> to vector<1x8x1xf32>
    %122 = tpu.reciprocal %121 {approx = true} : vector<1x8x1xf32> -> vector<1x8x1xf32>
    %123 = vector.broadcast %122 : vector<1x8x1xf32> to vector<1x8x8xf32>
    %124 = arith.mulf %119, %123 : vector<1x8x8xf32>
    %cst_42 = arith.constant dense<0.000000e+00> : vector<1x8x8xf32>
    %125 = tpu.matmul %124, %109, %cst_42 {dimension_numbers = #tpu.dot_dimension_numbers<[2], [1], [1], [2], [0, 0, 0, 1, 1, 2], [0], [0]>} : vector<1x8x8xf32>, vector<1x8x8xf32>, vector<1x8x8xf32> -> vector<1x8x8xf32>
    %126 = vector.shape_cast %125 : vector<1x8x8xf32> to vector<8x8xf32>
    %127 = tpu.concatenate %57, %80, %103, %126 in 1 : vector<8x8xf32>, vector<8x8xf32>, vector<8x8xf32>, vector<8x8xf32> -> vector<8x32xf32>
    %c0_43 = arith.constant 0 : index
    %c0_44 = arith.constant 0 : index
    %128 = vector.load %arg7[%c0_43, %c0_44] : memref<32x32xf32, #tpu.memory_space<vmem>>, vector<32x32xf32>
    %cst_45 = arith.constant dense<0.000000e+00> : vector<8x32xf32>
    %129 = tpu.matmul %127, %128, %cst_45 {dimension_numbers = #tpu.dot_dimension_numbers<[1], [0], [0], [1], [0, 0, 1, 1], [], []>} : vector<8x32xf32>, vector<32x32xf32>, vector<8x32xf32> -> vector<8x32xf32>
    %130 = arith.addf %1, %129 : vector<8x32xf32>
    %c0_46 = arith.constant 0 : index
    %c0_47 = arith.constant 0 : index
    %131 = vector.load %arg8[%c0_46, %c0_47] : memref<1x32xf32, #tpu.memory_space<vmem>>, vector<1x32xf32>
    %132 = vector.broadcast %131 : vector<1x32xf32> to vector<8x32xf32>
    %133 = arith.addf %130, %132 : vector<8x32xf32>
    %c0_48 = arith.constant 0 : index
    %c0_49 = arith.constant 0 : index
    %134 = vector.load %arg9[%c0_48, %c0_49] : memref<1x32xf32, #tpu.memory_space<vmem>>, vector<1x32xf32>
    %c0_50 = arith.constant 0 : index
    %c0_51 = arith.constant 0 : index
    %135 = vector.load %arg10[%c0_50, %c0_51] : memref<1x32xf32, #tpu.memory_space<vmem>>, vector<1x32xf32>
    %cst_52 = arith.constant dense<0.000000e+00> : vector<8xf32>
    %136 = vector.multi_reduction <add>, %133, %cst_52 [1] : vector<8x32xf32> to vector<8xf32>
    %137 = vector.shape_cast %136 : vector<8xf32> to vector<8x1xf32>
    %cst_53 = arith.constant 3.200000e+01 : f32
    %138 = vector.broadcast %cst_53 : f32 to vector<8x1xf32>
    %139 = arith.divf %137, %138 : vector<8x1xf32>
    %140 = vector.broadcast %139 : vector<8x1xf32> to vector<8x32xf32>
    %141 = arith.subf %133, %140 : vector<8x32xf32>
    %142 = arith.mulf %141, %141 : vector<8x32xf32>
    %cst_54 = arith.constant dense<0.000000e+00> : vector<8xf32>
    %143 = vector.multi_reduction <add>, %142, %cst_54 [1] : vector<8x32xf32> to vector<8xf32>
    %144 = vector.shape_cast %143 : vector<8xf32> to vector<8x1xf32>
    %cst_55 = arith.constant 3.200000e+01 : f32
    %145 = vector.broadcast %cst_55 : f32 to vector<8x1xf32>
    %146 = arith.divf %144, %145 : vector<8x1xf32>
    %147 = vector.broadcast %139 : vector<8x1xf32> to vector<8x32xf32>
    %148 = arith.subf %133, %147 : vector<8x32xf32>
    %cst_56 = arith.constant 9.99999974E-6 : f32
    %149 = vector.broadcast %cst_56 : f32 to vector<8x1xf32>
    %150 = arith.addf %146, %149 : vector<8x1xf32>
    %151 = math.rsqrt %150 : vector<8x1xf32>
    %152 = vector.broadcast %151 : vector<8x1xf32> to vector<8x32xf32>
    %153 = arith.mulf %148, %152 : vector<8x32xf32>
    %154 = vector.broadcast %134 : vector<1x32xf32> to vector<8x32xf32>
    %155 = arith.mulf %153, %154 : vector<8x32xf32>
    %156 = vector.broadcast %135 : vector<1x32xf32> to vector<8x32xf32>
    %157 = arith.addf %155, %156 : vector<8x32xf32>
    %c0_57 = arith.constant 0 : index
    %c0_58 = arith.constant 0 : index
    %158 = vector.load %arg11[%c0_57, %c0_58] : memref<32x128xf32, #tpu.memory_space<vmem>>, vector<32x128xf32>
    %cst_59 = arith.constant dense<0.000000e+00> : vector<8x128xf32>
    %159 = tpu.matmul %157, %158, %cst_59 {dimension_numbers = #tpu.dot_dimension_numbers<[1], [0], [0], [1], [0, 0, 1, 1], [], []>} : vector<8x32xf32>, vector<32x128xf32>, vector<8x128xf32> -> vector<8x128xf32>
    %c0_60 = arith.constant 0 : index
    %c0_61 = arith.constant 0 : index
    %160 = vector.load %arg12[%c0_60, %c0_61] : memref<1x128xf32, #tpu.memory_space<vmem>>, vector<1x128xf32>
    %161 = vector.broadcast %160 : vector<1x128xf32> to vector<8x128xf32>
    %162 = arith.addf %159, %161 : vector<8x128xf32>
    %cst_62 = arith.constant 0.000000e+00 : f32
    %163 = vector.broadcast %cst_62 : f32 to vector<8x128xf32>
    %164 = arith.maximumf %162, %163 : vector<8x128xf32>
    %c0_63 = arith.constant 0 : index
    %c0_64 = arith.constant 0 : index
    %165 = vector.load %arg13[%c0_63, %c0_64] : memref<128x32xf32, #tpu.memory_space<vmem>>, vector<128x32xf32>
    %cst_65 = arith.constant dense<0.000000e+00> : vector<8x32xf32>
    %166 = tpu.matmul %164, %165, %cst_65 {dimension_numbers = #tpu.dot_dimension_numbers<[1], [0], [0], [1], [0, 0, 1, 1], [], []>} : vector<8x128xf32>, vector<128x32xf32>, vector<8x32xf32> -> vector<8x32xf32>
    %167 = arith.addf %133, %166 : vector<8x32xf32>
    %c0_66 = arith.constant 0 : index
    %c0_67 = arith.constant 0 : index
    %168 = vector.load %arg14[%c0_66, %c0_67] : memref<1x32xf32, #tpu.memory_space<vmem>>, vector<1x32xf32>
    %169 = vector.broadcast %168 : vector<1x32xf32> to vector<8x32xf32>
    %170 = arith.addf %167, %169 : vector<8x32xf32>
    %171 = vector.shape_cast %170 : vector<8x32xf32> to vector<1x8x32xf32>
    %c0_68 = arith.constant 0 : index
    %c0_69 = arith.constant 0 : index
    %c0_70 = arith.constant 0 : index
    %172 = vector.load %arg15[%c0_68, %c0_69, %c0_70] : memref<1x8x32xf32, #tpu.memory_space<vmem>>, vector<1x8x32xf32>
    tpu.vector_store %arg15[%c0_68, %c0_69, %c0_70], %171 {strides = array<i32>} : memref<1x8x32xf32, #tpu.memory_space<vmem>>, vector<1x8x32xf32>,
    return
  }
  func.func @transform_0(%arg0: i32) -> (i32, i32, i32) {
    %c0_i32 = arith.constant 0 : i32
    %c0_i32_0 = arith.constant 0 : i32
    %c0_i32_1 = arith.constant 0 : i32
    return %arg0, %c0_i32, %c0_i32_0 : i32, i32, i32
  }
  func.func @transform_1(%arg0: i32) -> (i32, i32) {
    %c0_i32 = arith.constant 0 : i32
    %c0_i32_0 = arith.constant 0 : i32
    %c0_i32_1 = arith.constant 0 : i32
    return %c0_i32, %c0_i32_0 : i32, i32
  }
  func.func @transform_2(%arg0: i32) -> (i32, i32) {
    %c0_i32 = arith.constant 0 : i32
    %c0_i32_0 = arith.constant 0 : i32
    %c0_i32_1 = arith.constant 0 : i32
    return %c0_i32, %c0_i32_0 : i32, i32
  }
  func.func @transform_3(%arg0: i32) -> (i32, i32) {
    %c0_i32 = arith.constant 0 : i32
    %c0_i32_0 = arith.constant 0 : i32
    %c0_i32_1 = arith.constant 0 : i32
    return %c0_i32, %c0_i32_0 : i32, i32
  }
  func.func @transform_4(%arg0: i32) -> (i32, i32) {
    %c0_i32 = arith.constant 0 : i32
    %c0_i32_0 = arith.constant 0 : i32
    %c0_i32_1 = arith.constant 0 : i32
    return %c0_i32, %c0_i32_0 : i32, i32
  }
  func.func @transform_5(%arg0: i32) -> (i32, i32) {
    %c0_i32 = arith.constant 0 : i32
    %c0_i32_0 = arith.constant 0 : i32
    %c0_i32_1 = arith.constant 0 : i32
    return %c0_i32, %c0_i32_0 : i32, i32
  }
  func.func @transform_6(%arg0: i32) -> (i32, i32) {
    %c0_i32 = arith.constant 0 : i32
    %c0_i32_0 = arith.constant 0 : i32
    %c0_i32_1 = arith.constant 0 : i32
    return %c0_i32, %c0_i32_0 : i32, i32
  }
  func.func @transform_7(%arg0: i32) -> (i32, i32) {
    %c0_i32 = arith.constant 0 : i32
    %c0_i32_0 = arith.constant 0 : i32
    %c0_i32_1 = arith.constant 0 : i32
    return %c0_i32, %c0_i32_0 : i32, i32
  }
  func.func @transform_8(%arg0: i32) -> (i32, i32) {
    %c0_i32 = arith.constant 0 : i32
    %c0_i32_0 = arith.constant 0 : i32
    %c0_i32_1 = arith.constant 0 : i32
    return %c0_i32, %c0_i32_0 : i32, i32
  }
  func.func @transform_9(%arg0: i32) -> (i32, i32) {
    %c0_i32 = arith.constant 0 : i32
    %c0_i32_0 = arith.constant 0 : i32
    %c0_i32_1 = arith.constant 0 : i32
    return %c0_i32, %c0_i32_0 : i32, i32
  }
  func.func @transform_10(%arg0: i32) -> (i32, i32) {
    %c0_i32 = arith.constant 0 : i32
    %c0_i32_0 = arith.constant 0 : i32
    %c0_i32_1 = arith.constant 0 : i32
    return %c0_i32, %c0_i32_0 : i32, i32
  }
  func.func @transform_11(%arg0: i32) -> (i32, i32) {
    %c0_i32 = arith.constant 0 : i32
    %c0_i32_0 = arith.constant 0 : i32
    %c0_i32_1 = arith.constant 0 : i32
    return %c0_i32, %c0_i32_0 : i32, i32
  }
  func.func @transform_12(%arg0: i32) -> (i32, i32) {
    %c0_i32 = arith.constant 0 : i32
    %c0_i32_0 = arith.constant 0 : i32
    %c0_i32_1 = arith.constant 0 : i32
    return %c0_i32, %c0_i32_0 : i32, i32
  }
  func.func @transform_13(%arg0: i32) -> (i32, i32) {
    %c0_i32 = arith.constant 0 : i32
    %c0_i32_0 = arith.constant 0 : i32
    %c0_i32_1 = arith.constant 0 : i32
    return %c0_i32, %c0_i32_0 : i32, i32
  }
  func.func @transform_14(%arg0: i32) -> (i32, i32, i32) {
    %c0_i32 = arith.constant 0 : i32
    %c0_i32_0 = arith.constant 0 : i32
    %c0_i32_1 = arith.constant 0 : i32
    return %arg0, %c0_i32, %c0_i32_0 : i32, i32, i32
  }
}

</mosaic_0001>

<bundles_post_ra>
// kernel: tpu_custom_call.1
= control target key start
LH: loop header
LB: loop body
LE: loop exit
PB: predicated region body
PF: predicated region fallthrough
CT: control target
= control target key end

     0   :  { %s2690_s0 = inlined_call_operand.hbm [shape: f32[2,8,32], index: 0, kind: input, shape index: {}]   ;;  %s2691_s1 = inlined_call_operand.vmem [shape: f32[1,32], index: 1, kind: input, shape index: {}]   ;;  %s2692_s2 = inlined_call_operand.vmem [shape: f32[1,32], index: 2, kind: input, shape index: {}]   ;;  %s2693_s3 = inlined_call_operand.vmem [shape: f32[32,32], index: 3, kind: input, shape index: {}]   ;;  %s2694_s4 = inlined_call_operand.vmem [shape: f32[32,32], index: 4, kind: input, shape index: {}]   ;;  %s2695_s5 = inlined_call_operand.vmem [shape: f32[32,32], index: 5, kind: input, shape index: {}]   ;;  %s2696_s6 = inlined_call_operand.vmem [shape: f32[32,32], index: 6, kind: input, shape index: {}]   ;;  %s2697_s7 = inlined_call_operand.vmem [shape: f32[1,32], index: 7, kind: input, shape index: {}]   ;;  %s2698_s8 = inlined_call_operand.vmem [shape: f32[1,32], index: 8, kind: input, shape index: {}]   ;;  %s2699_s9 = inlined_call_operand.vmem [shape: f32[1,32], index: 9, kind: input, shape index: {}]   ;;  %s2700_s10 = inlined_call_operand.vmem [shape: f32[32,128], index: 10, kind: input, shape index: {}]   ;;  %s2701_s11 = inlined_call_operand.vmem [shape: f32[1,128], index: 11, kind: input, shape index: {}]   ;;  %s2702_s12 = inlined_call_operand.vmem [shape: f32[128,32], index: 12, kind: input, shape index: {}]   ;;  %s2703_s13 = inlined_call_operand.vmem [shape: f32[1,32], index: 13, kind: input, shape index: {}]   ;;  %s2704_s14 = inlined_call_operand.hbm [shape: f32[2,8,32], index: 14, kind: output, shape index: {}]  }
   0x1   :  { %2713 = sst [smem:[#allocation13_spill]] %s2703_s13 }
   0x2   :  { %2714 = sst [smem:[#allocation14_spill]] %s2704_s14 }
   0x3   :  { %19 = vsyncpa [#allocation3], 0 }
   0x4   :  { %21 = vsyncpa [#allocation3 + $0x1], 0 }
   0x5   :  { %22 = vsyncpa [#allocation4], 0 }
   0x6   :  { %24 = vsyncpa [#allocation4 + $0x1], 0  ;;  %s2284_s29 = smov 0   ;;  %s2286_s30 = smov 0  }
   0x7   :  { %s2288_s15 = smov 0   ;;  %s2290_s16 = smov 0  }
   0x8 LB: > { %2715 = sst [smem:[#allocation8_spill]] %s2185_s29  ;;  %s2305_s17 = sadd.s32 4294967295, %s2197_s16   ;;  %s2197_s16 = sphi %s2290_s16, %s2735_s16   ;;  %s2193_s15 = sphi %s2288_s15, %s2737_s15   ;;  %s2189_s30 = sphi %s2286_s30, %s2739_s30   ;;  %s2185_s29 = sphi %s2284_s29, %s2738_s29  }
   0x9   : > { %2716 = sst [smem:[#allocation9_spill]] %s2193_s15  ;;  %s1807_s18 = sadd.s32 4294967294, %s2197_s16  }
   0xa   : > { %s2309_s19 = sadd.s32 1, %s2197_s16   ;;  %s37_s20 = sadd.s32 1, %s2193_s15 }
   0xb   : > { %2717 = sst [smem:[#allocation10_spill]] %s2309_s19  ;;  %s34_s21 = ssub.s32 %s2197_s16, %s2309_s19 }
   0xc   : > { %p44_p0 = scmp.ne.s32.totalorder %s2193_s15, %s2189_s30  ;;  %p35_p1 = scmp.eq.s32.totalorder %s34_s21, 0 }
   0xd   : > { %p45_p2 = scmp.eq.s32.totalorder %s2197_s16, 0  ;;  %p50_p3 = scmp.ne.s32.totalorder %s2189_s30, %s2185_s29 }
   0xe   : > { %p51_p4 = scmp.eq.s32.totalorder %s2305_s17, 0  ;;  %p347_p7 = scmp.eq.s32.totalorder %s2305_s17, 1 }
   0xf   : > { %s2321_s22 = scalar_select %p35_p1, %s2193_s15, %s37_s20  }
  0x10   : > { %p2323_p5 = por %p45_p2, %p44_p0  ;;  %p2327_p6 = por %p51_p4, %p50_p3 }
  0x11   : > { %2718 = sst [smem:[#allocation11_spill]] %s2321_s22  ;;  %p353_p8 = scmp.eq.s32.totalorder %s1807_s18, 1 }
  0x12   : > { %s2720_s24 = scalar_select %p2327_p6, 1, 0 }
  0x13   : > { %p2043_p10 = scmp.lt.s32.totalorder %s2197_s16, 2  ;;  %p2334_p11 = por %p347_p7, %p44_p0 }
  0x14   : > { %p2338_p12 = por %p353_p8, %p50_p3  ;;  %s412_s27 = sand.u32 1, %s2193_s15  }
  0x15   : > { %s2721_s25 = scalar_select %p2334_p11, 1, 0 }
  0x16   : > { %s2722_s26 = scalar_select %p2338_p12, 1, 0 }
  0x17   : > { %s1811_s28 = sshll.u32 %s2197_s16, 7  ;;  %s1810_s20 = sshll.u32 %s412_s27, 3 }
  0x18   : > { %2723 = sst [smem:[#allocation12_spill]] %s2722_s26  ;;  %s2347_s19 = scalar_lea.hbm %s2690_s0, %s1811_s28 }
  0x19   : > { %s416_s18 = scalar_lea.vmem [#allocation2], %s1810_s20  ;;  %p2351_p13 = pnand %p2043_p10, %p2323_p5 }
  0x1a   : > { %s423_s29 = sshll.u32 %s416_s18, 4  ;;  %s413_s15 = scalar_lea.sflag [#allocation3], %s412_s27  ;;  %s2355_s29 = int_to_ptr.vmem [resolvable:$true] %s423_s29 }
  0x1b   : > { %s2105_s26 = scalar_lea.hbm %s2347_s19, 128  ;;  %p2107_p3 = pneg %p2351_p13 }
  0x1c   : > { %p2106_p2 = scmp.ne.s32.totalorder %s2347_s19, %s2105_s26  ;;  %s2110_s23 = scalar_lea.hbm %s2690_s0, 256 }
  0x1d   : > { %p2111_p5 = scmp.lt.s32.totalorder %s2347_s19, %s2690_s0  ;;  %p2112_p8 = scmp.lt.s32.totalorder %s2110_s23, %s2105_s26 }
  0x1e   : > { %p2108_p4 = pnand %p2107_p3, %p2106_p2 }
  0x1f   : > { %p2113_p10 = por %p2112_p8, %p2111_p5 }
  0x20   : > { %p2109_p7 = pneg %p2108_p4 }
  0x22   : > { %p2114_p9 = pnand %p2113_p10, %p2109_p7 }
  0x24   : > { %2117 = shalt.err (!%p2114_p9)
}
  0x25   : > { %s2118_s27 = scalar_lea.vmem %s2355_s29, 128  ;;  %s2199_s18 = smov [#allocation2]  }
  0x26   : > { %p2119_p0 = scmp.ne.s32.totalorder %s2355_s29, %s2118_s27  ;;  %s2123_s13 = sshll.u32 %s2199_s18, 4  ;;  %s2124_s13 = int_to_ptr.vmem [resolvable:$false] %s2123_s13 }
  0x27   : > { %s2125_s22 = scalar_lea.vmem %s2124_s13, 256  ;;  %p2126_p4 = scmp.lt.s32.totalorder %s2355_s29, %s2124_s13 }
  0x28   : > { %p2121_p1 = pnand %p2119_p0, %p2107_p3  ;;  %p2127_p12 = scmp.lt.s32.totalorder %s2125_s22, %s2118_s27 }
  0x2a   : > { %p2122_p2 = pneg %p2121_p1  ;;  %p2128_p11 = por %p2127_p12, %p2126_p4 }
  0x2c   : > { %p2129_p6 = pnand %p2128_p11, %p2122_p2 }
  0x2e   : > { %2132 = shalt.err (!%p2129_p6)
}
  0x2f   : > { %2038 = dma.hbm_to_vmem [thread:$0]  (!%p2351_p13), %s2347_s19, 128, %s2355_s29, %s413_s15  }
  0x30   : > { %p2725_p9 = scmp.lt.s32.totalorder %s2197_s16, 3  ;;  %p2726_p7 = scmp.ge.s32.totalorder %s2197_s16, 1 }
  0x32   : > { %p429_p0 = pnand %p2726_p7, %p2725_p9 }
  0x33   : > { %s2382_s26 = sand.u32 (!%p429_p0), 1, %s2189_s30   ;;  %p2727_p6 = scmp.ne.s32.totalorder (!%p429_p0), %s2720_s24, 0 }
  0x34   : > { %432 = sbr.rel (%p429_p0) target bundleno = 2465 (0x9a1), region = 76  ;;  %s1813_s13 = sshll.u32 (!%p429_p0), %s2382_s26, 3 }
  0x35   : > { %s435_s28 = scalar_lea.sflag (!%p429_p0), [#allocation3], %s2382_s26  ;;  %s438_s14 = scalar_lea.vmem (!%p429_p0), [#allocation2], %s1813_s13 }
  0x39   : > { %2176 = dma.done.wait (%p2727_p6), %s435_s28, 128  }
  0x3a   : > { %2178 = vsyncadd (%p2727_p6), %s435_s28, 4294967168  ;;  %vm486_vm0 = vcmask 261120   ;;  %v2392_v0 = vld [vmem:[%s438_s14] sm:$0xff]  ;;  %v518_v7 = vld [vmem:[%s2693_s3 + $0x18] sm:$0xff]  ;;  %v2200_v8 = vmov 0.0   ;;  %vm2201_vm1 = vmmov 0   ;;  %v740_v41 = vlaneseq }
  0x3b   : > { %v487_v1 = vsel %vm486_vm0, %v2392_v0, 0.0  ;;  %1901 = vmatprep.subr.mxu1 %v2200_v8  ;;  %v517_v9 = vld [vmem:[%s2693_s3 + $0x10] sm:$0xff]  ;;  %1909 = vmatprep.mubr.msk.f32.mxu1 %vm2201_vm1, %v2200_v8  ;;  %v516_v10 = vld [vmem:[%s2693_s3 + $0x8] sm:$0xff]  ;;  %v515_v11 = vld [vmem:[%s2693_s3] sm:$0xff]  ;;  %vm745_vm2 = vcmask 64512   ;;  %s2202_s23 = smov 112  }
  0x3c   : > { %488 = vadd.xlane.f32.xlu0 %v487_v1  ;;  %1902 = vmatpush3.msra.mxu1 %v518_v7  ;;  %v1815_v16 = vld [vmem:[%s2691_s1] ss:$0 sm:$0xff]  ;;  %v595_v21 = vld [vmem:[%s2694_s4 + $0x18] sm:$0xff]  ;;  %v594_v22 = vld [vmem:[%s2694_s4 + $0x10] sm:$0xff]  ;;  %s2203_s20 = smov 120   ;;  %s2204_s21 = smov 104  }
  0x3d   : > { %1944 = vmatprep.subr.mxu0 %v2200_v8  ;;  %1903 = vmatprep.subr.mxu1 %v2200_v8  ;;  %v1816_v18 = vld [vmem:[%s2692_s2] ss:$0 sm:$0xff]  ;;  %v593_v23 = vld [vmem:[%s2694_s4 + $0x8] sm:$0xff]  ;;  %v669_v25 = vld [vmem:[%s2695_s5 + $0x18] sm:$0xff]  ;;  %v741_v42 = vshrl.u32 %v740_v41, 7  ;;  %v743_v43 = vand.u32 127, %v740_v41 }
  0x3e   : > { %1946 = vmatprep.mubr.msk.f32.mxu0 %vm2201_vm1, %v2200_v8  ;;  %1904 = vmatpush3.msra.mxu1 %v517_v9  ;;  %v592_v24 = vld [vmem:[%s2694_s4] sm:$0xff]  ;;  %v668_v26 = vld [vmem:[%s2695_s5 + $0x10] sm:$0xff]  ;;  %v667_v27 = vld [vmem:[%s2695_s5 + $0x8] sm:$0xff]  ;;  %s2205_s15 = smov 8   ;;  %s2206_s19 = smov 16   ;;  %vm1423_vm4 = vcmask 130048  }
  0x3f   : > { %1905 = vmatprep.subr.mxu1 %v2200_v8  ;;  %v666_v28 = vld [vmem:[%s2695_s5] sm:$0xff]  ;;  %vm744_vm3 = vcmp.le.s32.totalorder %v743_v43, %v741_v42  ;;  %v1428_v41 = vld [vmem:[%s2696_s6 + $0x8] sm:$0xff]  ;;  %vm1425_vm5 = vcmask 195584   ;;  %s2728_s18 = sld [smem:[#allocation13_spill]]  ;;  %s1840_s22 = sshll.u32 %s2305_s17, 7 }
  0x40   : > { %1906 = vmatpush3.msra.mxu1 %v516_v10  ;;  %s482_s28 = scalar_lea.vmem [#allocation5], %s1813_s13  ;;  %p2730_p12 = scmp.ne.s32.totalorder %s2721_s25, 0 }
  0x41   : > { %1907 = vmatprep.subr.mxu1 %v2200_v8  ;;  %s1737_s14 = sshll.u32 %s482_s28, 4  ;;  %s2208_s17 = smov [#allocation5]   ;;  %s1738_s14 = int_to_ptr.vmem [resolvable:$true] %s1737_s14 }
  0x42   : > { %1908 = vmatpush3.msra.mxu1 %v515_v11  ;;  %s2137_s13 = sshll.u32 %s2208_s17, 4  ;;  %s2138_s13 = int_to_ptr.vmem [resolvable:$false] %s2137_s13 }
  0x43   : > { %1912 = vmatprep.subr.mxu1 %v2200_v8  ;;  %p2140_p3 = scmp.lt.s32.totalorder %s1738_s14, %s2138_s13 }
  0xc5   : > { %v489_v2 = vpop.xlane.xlu0 %488 }
  0xc6   : > { %v491_v3 = vmul.f32 0.03125, %v489_v2 }
  0xc8   : > { %v492_v4 = vsub.f32 %v2392_v0, %v491_v3 }
  0xca   : > { %v493_v5 = vmul.f32 %v492_v4, %v492_v4 }
  0xcc   : > { %v494_v6 = vsel %vm486_vm0, %v493_v5, 0.0 }
  0xcd   : > { %495 = vadd.xlane.f32.xlu0 %v494_v6 }
 0x156   : > { %v496_v12 = vpop.xlane.xlu0 %495 }
 0x157   : > { %v497_v13 = vmul.f32 0.03125, %v496_v12 }
 0x159   : > { %v498_v14 = vadd.f32 1e-05, %v497_v13 }
 0x15b   : > { %2085 = vrsqrt.f32 %v498_v14 }
 0x168   : > { %v2086_v15 = vpop.eup %2085 }
 0x169   : > { %v500_v17 = vmul.f32 %v2086_v15, %v492_v4 }
 0x16b   : > { %v507_v19 = vmul.f32 %v1815_v16, %v500_v17 }
 0x16d   : > { %v514_v20 = vadd.f32 %v1816_v18, %v507_v19 }
 0x16f   : > { %1910 = vmatmul.mubr.msk.f32.vlgmr.msra.gmra.mxu1 %vm486_vm0, %v514_v20 }
 0x170   : > { %1913 = vmatpush3.msra.mxu1 %v595_v21  ;;  %1920 = vmatprep.mubr.msk.f32.mxu1 %vm2201_vm1, %v2200_v8 }
 0x171   : > { %1914 = vmatprep.subr.mxu1 %v2200_v8 }
 0x172   : > { %1915 = vmatpush3.msra.mxu1 %v594_v22 }
 0x173   : > { %1916 = vmatprep.subr.mxu1 %v2200_v8 }
 0x174   : > { %1917 = vmatpush3.msra.mxu1 %v593_v23 }
 0x175   : > { %1918 = vmatprep.subr.mxu1 %v2200_v8 }
 0x176   : > { %1919 = vmatpush3.msra.mxu1 %v592_v24 }
 0x177   : > { %1921 = vmatmul.mubr.msk.f32.vlgmr.msra.gmra.mxu1 %vm486_vm0, %v514_v20  ;;  %1923 = vmatprep.subr.mxu1 %v2200_v8 }
 0x178   : > { %1924 = vmatpush3.msra.mxu1 %v669_v25  ;;  %1931 = vmatprep.mubr.msk.f32.mxu1 %vm2201_vm1, %v2200_v8 }
 0x179   : > { %1925 = vmatprep.subr.mxu1 %v2200_v8 }
 0x17a   : > { %1926 = vmatpush3.msra.mxu1 %v668_v26 }
 0x17b   : > { %1927 = vmatprep.subr.mxu1 %v2200_v8 }
 0x17c   : > { %1928 = vmatpush3.msra.mxu1 %v667_v27 }
 0x17d   : > { %1929 = vmatprep.subr.mxu1 %v2200_v8 }
 0x17e   : > { %1930 = vmatpush3.msra.mxu1 %v666_v28 }
 0x17f   : > { %1932 = vmatmul.mubr.msk.f32.vlgmr.msra.gmra.mxu1 %vm486_vm0, %v514_v20  ;;  %1934 = vmatprep.subr.mxu1 %v2200_v8 }
 0x180   : > { %1936 = vmatprep.mubr.msk.f32.mxu1 %vm2201_vm1, %v2200_v8 }
 0x22f   : > { %v588_v29 = vpop.f32.mrf.mxu1 }
 0x230   : > { %1078 = vrot.lane.b32.xlu0 %v588_v29, %s2202_s23  ;;  %910 = vrot.lane.b32.xlu1 %v588_v29, %s2203_s20 }
 0x231   : > { %1935 = vmatpush3.xpose.msk.msra.mxu1 %vm745_vm2, %v588_v29  ;;  %v1911_v30 = vpop.f32.mrf.mxu1 }
 0x232   : > { %1939 = vmatprep.subr.mxu1 %v2200_v8 }
 0x234   : > { %1245 = vrot.lane.b32.xlu1 %v588_v29, %s2204_s21 }
 0x237   : > { %v662_v31 = vpop.f32.mrf.mxu1 }
 0x238   : > { %1937 = vmatmul.mubr.msk.f32.vlgmr.msra.gmra.mxu1 %vm745_vm2, %v662_v31  ;;  %908 = vrot.lane.b32.xlu1 %v662_v31, %s2203_s20 }
 0x239   : > { %v1922_v32 = vpop.f32.mrf.mxu1  ;;  %1941 = vmatprep.mubr.msk.f32.mxu1 %vm2201_vm1, %v2200_v8 }
 0x23c   : > { %1076 = vrot.lane.b32.xlu1 %v662_v31, %s2202_s23 }
 0x23f   : > { %v2477_v33 = vpop.f32.mrf.mxu1 }
 0x240   : > { %1940 = vmatpush3.msra.mxu1 %v2477_v33  ;;  %1243 = vrot.lane.b32.xlu1 %v662_v31, %s2204_s21 }
 0x241   : > { %v1933_v34 = vpop.f32.mrf.mxu1  ;;  %1949 = vmatprep.subr.mxu1 %v2200_v8 }
 0x2a2   : > { %v911_v35 = vpop.permute.xlu1 %910  ;;  %v1079_v38 = vpop.permute.xlu0 %1078 }
 0x2a3   : > { %1945 = vmatpush3.xpose.msk.msra.mxu0 %vm745_vm2, %v911_v35 }
 0x2a4   : > { %1954 = vmatprep.subr.mxu0 %v2200_v8 }
 0x2a6   : > { %v1246_v36 = vpop.permute.xlu1 %1245 }
 0x2aa   : > { %v909_v37 = vpop.permute.xlu1 %908 }
 0x2ab   : > { %1947 = vmatmul.mubr.msk.f32.vlgmr.msra.gmra.mxu0 %vm745_vm2, %v909_v37 }
 0x2ac   : > { %1955 = vmatpush3.xpose.msk.msra.mxu0 %vm745_vm2, %v1079_v38  ;;  %1956 = vmatprep.mubr.msk.f32.mxu0 %vm2201_vm1, %v2200_v8 }
 0x2ad   : > { %1964 = vmatprep.subr.mxu0 %v2200_v8 }
 0x2ae   : > { %v1077_v39 = vpop.permute.xlu1 %1076 }
 0x2af   : > { %1957 = vmatmul.mubr.msk.f32.vlgmr.msra.gmra.mxu0 %vm745_vm2, %v1077_v39  ;;  %v1430_v39 = vld [vmem:[%s2696_s6 + $0x18] sm:$0xff] }
 0x2b0   : > { %1965 = vmatpush3.xpose.msk.msra.mxu0 %vm745_vm2, %v1246_v36  ;;  %1966 = vmatprep.mubr.msk.f32.mxu0 %vm2201_vm1, %v2200_v8 }
 0x2b1   : > { %1974 = vmatprep.subr.mxu0 %v2200_v8 }
 0x2b2   : > { %v1244_v40 = vpop.permute.xlu1 %1243 }
 0x2b3   : > { %1967 = vmatmul.mubr.msk.f32.vlgmr.msra.gmra.mxu0 %vm745_vm2, %v1244_v40  ;;  %v1429_v40 = vld [vmem:[%s2696_s6 + $0x10] sm:$0xff] }
 0x2b4   : > { %1982 = vmatprep.mubr.msk.f32.mxu0 %vm2201_vm1, %v2200_v8  ;;  %1975 = vmatpush3.msra.mxu0 %v1430_v39 }
 0x2b5   : > { %1976 = vmatprep.subr.mxu0 %v2200_v8 }
 0x2b6   : > { %1977 = vmatpush3.msra.mxu0 %v1429_v40 }
 0x2b7   : > { %1978 = vmatprep.subr.mxu0 %v2200_v8 }
 0x2b8   : > { %1979 = vmatpush3.msra.mxu0 %v1428_v41 }
 0x2b9   : > { %1980 = vmatprep.subr.mxu0 %v2200_v8 }
 0x2f8   : > { %v818_v44 = vpop.f32.mrf.mxu1 }
 0x2f9   : > { %v822_v45 = vsel %vm744_vm3, %v818_v44, -inf }
 0x2fa   : > { %v823_v46 = vmul.f32 0.35355338, %v822_v45  ;;  %v1938_v47 = vpop.f32.mrf.mxu1 }
 0x2fc   : > { %v824_v48 = vsel %vm745_vm2, %v823_v46, -inf }
 0x2fd   : > { %825 = vmax.xlane.f32.xlu1 %v824_v48 }
 0x36b   : > { %v982_v49 = vpop.f32.mrf.mxu0 }
 0x36c   : > { %v986_v50 = vsel %vm744_vm3, %v982_v49, -inf }
 0x36d   : > { %v987_v51 = vmul.f32 0.35355338, %v986_v50  ;;  %v1948_v52 = vpop.f32.mrf.mxu0 }
 0x36f   : > { %v1150_v53 = vpop.f32.mrf.mxu0  ;;  %v988_v54 = vsel %vm745_vm2, %v987_v51, -inf }
 0x370   : > { %v1154_v55 = vsel %vm744_vm3, %v1150_v53, -inf  ;;  %989 = vmax.xlane.f32.xlu0 %v988_v54 }
 0x371   : > { %v1155_v56 = vmul.f32 0.35355338, %v1154_v55  ;;  %v1958_v57 = vpop.f32.mrf.mxu0 }
 0x373   : > { %v1317_v58 = vpop.f32.mrf.mxu0  ;;  %v1156_v59 = vsel %vm745_vm2, %v1155_v56, -inf }
 0x374   : > { %v1321_v60 = vsel %vm744_vm3, %v1317_v58, -inf  ;;  %1157 = vmax.xlane.f32.xlu1 %v1156_v59 }
 0x375   : > { %v1322_v61 = vmul.f32 0.35355338, %v1321_v60  ;;  %v1968_v62 = vpop.f32.mrf.mxu0 }
 0x377   : > { %v1323_v63 = vsel %vm745_vm2, %v1322_v61, -inf }
 0x378   : > { %1324 = vmax.xlane.f32.xlu1 %v1323_v63 }
 0x386   : > { %v826_v1 = vpop.xlane.xlu1 %825 }
 0x387   : > { %v827_v2 = vsub.f32 %v823_v46, %v826_v1  ;;  %v1427_v46 = vld [vmem:[%s2696_s6] sm:$0xff] }
 0x388   : > { %1981 = vmatpush3.msra.mxu0 %v1427_v46 }
 0x389   : > { %v828_v3 = vmul.f32 1.442695, %v827_v2  ;;  %1996 = vmatprep.subr.mxu0 %v2200_v8 }
 0x38b   : > { %2087 = vpow2.f32 %v828_v3  ;;  %v1545_v3 = vld [vmem:[%s2700_s10 + $0x18] sm:$0xff] }
 0x398   : > { %v2088_v4 = vpop.eup %2087 }
 0x399   : > { %v830_v5 = vsel %vm745_vm2, %v2088_v4, 0.0 }
 0x39a   : > { %831 = vadd.xlane.f32.xlu0 %v830_v5  ;;  %v1542_v5 = vld [vmem:[%s2700_s10] sm:$0xff] }
 0x3f9   : > { %v990_v6 = vpop.xlane.xlu0 %989 }
 0x3fa   : > { %v991_v7 = vsub.f32 %v987_v51, %v990_v6  ;;  %v1642_v6 = vld [vmem:[%s2702_s12 + $0x78] sm:$0xff] }
 0x3fc   : > { %v992_v9 = vmul.f32 1.442695, %v991_v7  ;;  %v1641_v7 = vld [vmem:[%s2702_s12 + $0x70] sm:$0xff] }
 0x3fd   : > { %v1158_v10 = vpop.xlane.xlu1 %1157 }
 0x3fe   : > { %2089 = vpow2.f32 %v992_v9  ;;  %v1159_v11 = vsub.f32 %v1155_v56, %v1158_v10  ;;  %v1833_v56 = vld [vmem:[%s2697_s7] ss:$0 sm:$0xff]  ;;  %v1640_v9 = vld [vmem:[%s2702_s12 + $0x68] sm:$0xff] }
 0x3ff   : > { %v1639_v10 = vld [vmem:[%s2702_s12 + $0x60] sm:$0xff] }
 0x400   : > { %v1160_v12 = vmul.f32 1.442695, %v1159_v11  ;;  %v1638_v11 = vld [vmem:[%s2702_s12 + $0x58] sm:$0xff] }
 0x401   : > { %v1325_v18 = vpop.xlane.xlu1 %1324 }
 0x402   : > { %2091 = vpow2.f32 %v1160_v12  ;;  %v1326_v19 = vsub.f32 %v1322_v61, %v1325_v18  ;;  %v1637_v12 = vld [vmem:[%s2702_s12 + $0x50] sm:$0xff]  ;;  %v1631_v18 = vld [vmem:[%s2702_s12 + $0x20] sm:$0xff] }
 0x404   : > { %v1327_v20 = vmul.f32 1.442695, %v1326_v19  ;;  %v1630_v19 = vld [vmem:[%s2702_s12 + $0x18] sm:$0xff] }
 0x40b   : > { %v2090_v13 = vpop.eup %2089 }
 0x40c   : > { %v994_v14 = vsel %vm745_vm2, %v2090_v13, 0.0 }
 0x40d   : > { %995 = vadd.xlane.f32.xlu1 %v994_v14  ;;  %v1635_v14 = vld [vmem:[%s2702_s12 + $0x40] sm:$0xff] }
 0x40f   : > { %v2092_v15 = vpop.eup %2091 }
 0x410   : > { %v1162_v16 = vsel %vm745_vm2, %v2092_v15, 0.0 }
 0x411   : > { %1163 = vadd.xlane.f32.xlu0 %v1162_v16  ;;  %v1633_v16 = vld [vmem:[%s2702_s12 + $0x30] sm:$0xff] }
 0x41e   : > { %1167 = vrot.lane.b32.xlu1 %v2477_v33, %s2202_s23  ;;  %s1724_s23 = scalar_lea.sflag [#allocation4], %s2382_s26 }
 0x423   : > { %v832_v17 = vpop.xlane.xlu0 %831 }
 0x424   : > { %2093 = vrcp.f32 %v832_v17  ;;  %v1632_v17 = vld [vmem:[%s2702_s12 + $0x28] sm:$0xff] }
 0x425   : > { %2095 = vpow2.f32 %v1327_v20 }
 0x427   : > { %1000 = vrot.lane.b32.xlu0 %v2477_v33, %s2203_s20  ;;  %s2207_s20 = smov 24  }
 0x431   : > { %v2094_v21 = vpop.eup %2093 }
 0x432   : > { %v834_v22 = vmul.f32 %v2094_v21, %v2088_v4  ;;  %v2096_v23 = vpop.eup %2095  ;;  %v1543_v4 = vld [vmem:[%s2700_s10 + $0x8] sm:$0xff] }
 0x433   : > { %v1329_v24 = vsel %vm745_vm2, %v2096_v23, 0.0 }
 0x434   : > { %1942 = vmatmul.mubr.msk.f32.vlgmr.msra.gmra.mxu1 %vm745_vm2, %v834_v22 }
 0x435   : > { %1951 = vmatprep.mubr.msk.f32.mxu1 %vm2201_vm1, %v2200_v8 }
 0x442   : > { %1330 = vadd.xlane.f32.xlu1 %v1329_v24  ;;  %v1834_v24 = vld [vmem:[%s2698_s8] ss:$0 sm:$0xff] }
 0x453   : > { %1334 = vrot.lane.b32.xlu1 %v2477_v33, %s2204_s21  ;;  %s2139_s21 = scalar_lea.vmem %s2138_s13, 256 }
 0x496   : > { %v996_v25 = vpop.xlane.xlu1 %995 }
 0x497   : > { %2097 = vrcp.f32 %v996_v25 }
 0x49a   : > { %v1164_v26 = vpop.xlane.xlu0 %1163  ;;  %v1168_v30 = vpop.permute.xlu1 %1167 }
 0x49b   : > { %2099 = vrcp.f32 %v1164_v26  ;;  %v1835_v26 = vld [vmem:[%s2699_s9] ss:$0 sm:$0xff] }
 0x49e   : > { %v1001_v27 = vpop.permute.xlu0 %1000 }
 0x49f   : > { %1950 = vmatpush3.msra.mxu1 %v1001_v27 }
 0x4a0   : > { %1959 = vmatprep.subr.mxu1 %v2200_v8 }
 0x4a4   : > { %v2098_v28 = vpop.eup %2097 }
 0x4a5   : > { %v998_v29 = vmul.f32 %v2098_v28, %v2090_v13  ;;  %v1636_v13 = vld [vmem:[%s2702_s12 + $0x48] sm:$0xff] }
 0x4a7   : > { %1952 = vmatmul.mubr.msk.f32.vlgmr.msra.gmra.mxu1 %vm745_vm2, %v998_v29  ;;  %v1629_v29 = vld [vmem:[%s2702_s12 + $0x10] sm:$0xff] }
 0x4a8   : > { %v2100_v31 = vpop.eup %2099  ;;  %1960 = vmatpush3.msra.mxu1 %v1168_v30  ;;  %1961 = vmatprep.mubr.msk.f32.mxu1 %vm2201_vm1, %v2200_v8  ;;  %v1628_v30 = vld [vmem:[%s2702_s12 + $0x8] sm:$0xff] }
 0x4a9   : > { %v1166_v32 = vmul.f32 %v2100_v31, %v2092_v15  ;;  %1969 = vmatprep.subr.mxu1 %v2200_v8  ;;  %v1634_v15 = vld [vmem:[%s2702_s12 + $0x38] sm:$0xff]  ;;  %v1627_v31 = vld [vmem:[%s2702_s12] sm:$0xff] }
 0x4ab   : > { %1962 = vmatmul.mubr.msk.f32.vlgmr.msra.gmra.mxu1 %vm745_vm2, %v1166_v32  ;;  %v1836_v32 = vld [vmem:[%s2701_s11] ss:$0 sm:$0xff] }
 0x4ac   : > { %1971 = vmatprep.mubr.msk.f32.mxu1 %vm2201_vm1, %v2200_v8 }
 0x4cb   : > { %v1331_v33 = vpop.xlane.xlu1 %1330 }
 0x4cc   : > { %2101 = vrcp.f32 %v1331_v33 }
 0x4cf   : > { %v1335_v34 = vpop.permute.xlu1 %1334 }
 0x4d0   : > { %1970 = vmatpush3.msra.mxu1 %v1335_v34 }
 0x4d1   : > { %1985 = vmatprep.subr.mxu1 %v2200_v8 }
 0x4d9   : > { %v2102_v35 = vpop.eup %2101 }
 0x4da   : > { %v1333_v36 = vmul.f32 %v2102_v35, %v2096_v23 }
 0x4dc   : > { %1972 = vmatmul.mubr.msk.f32.vlgmr.msra.gmra.mxu1 %vm745_vm2, %v1333_v36 }
 0x4dd   : > { %1993 = vmatprep.mubr.msk.f32.mxu1 %vm2201_vm1, %v2200_v8  ;;  %1986 = vmatpush3.msra.mxu1 %v1545_v3 }
 0x4de   : > { %1987 = vmatprep.subr.mxu1 %v2200_v8 }
 0x4f4   : > { %v904_v37 = vpop.f32.mrf.mxu1 }
 0x4f6   : > { %v1943_v38 = vpop.f32.mrf.mxu1 }
 0x4f7   : > { %v1838_v38 = vld [vmem:[%s2728_s18] ss:$0 sm:$0xff] }
 0x567   : > { %v1072_v42 = vpop.f32.mrf.mxu1 }
 0x568   : > { %1411 = vrot.lane.b32.xlu0 %v1072_v42, %s2205_s15 }
 0x569   : > { %v1953_v43 = vpop.f32.mrf.mxu1 }
 0x56b   : > { %v1239_v44 = vpop.f32.mrf.mxu1 }
 0x56c   : > { %1415 = vrot.lane.b32.xlu1 %v1239_v44, %s2206_s19  ;;  %s2729_s19 = sld [smem:[#allocation14_spill]] }
 0x56d   : > { %v1963_v45 = vpop.f32.mrf.mxu1 }
 0x572   : > { %s1735_s24 = scalar_lea.hbm %s2729_s19, %s1840_s22 }
 0x59c   : > { %v1406_v47 = vpop.f32.mrf.mxu1 }
 0x59d   : > { %1419 = vrot.lane.b32.xlu0 %v1406_v47, %s2207_s20  ;;  %s2133_s20 = scalar_lea.vmem %s1738_s14, 128 }
 0x59e   : > { %v1973_v48 = vpop.f32.mrf.mxu1  ;;  %p2134_p11 = scmp.ne.s32.totalorder %s1738_s14, %s2133_s20  ;;  %p2141_p5 = scmp.lt.s32.totalorder %s2139_s21, %s2133_s20 }
 0x5a0   : > { %p2135_p13 = pnand %p2134_p11, %p2730_p12  ;;  %p2142_p8 = por %p2141_p5, %p2140_p3 }
 0x5a2   : > { %p2136_p1 = pneg %p2135_p13 }
 0x5a4   : > { %p2143_p10 = pnand %p2142_p8, %p2136_p1 }
 0x5da   : > { %v1412_v49 = vpop.permute.xlu0 %1411 }
 0x5db   : > { %v1422_v51 = vsel %vm745_vm2, %v904_v37, %v1412_v49 }
 0x5de   : > { %v1416_v50 = vpop.permute.xlu1 %1415 }
 0x5df   : > { %v1424_v52 = vsel %vm1423_vm4, %v1422_v51, %v1416_v50 }
 0x60f   : > { %v1420_v53 = vpop.permute.xlu0 %1419 }
 0x610   : > { %v1426_v54 = vsel %vm1425_vm5, %v1424_v52, %v1420_v53 }
 0x611   : > { %1983 = vmatmul.mubr.msk.f32.vlgmr.msra.gmra.mxu0 %vm486_vm0, %v1426_v54 }
 0x612   : > { %2028 = vmatprep.mubr.msk.f32.mxu0 %vm2201_vm1, %v2200_v8  ;;  %1997 = vmatpush3.msra.mxu0 %v1642_v6 }
 0x613   : > { %1998 = vmatprep.subr.mxu0 %v2200_v8 }
 0x614   : > { %1999 = vmatpush3.msra.mxu0 %v1641_v7 }
 0x615   : > { %2000 = vmatprep.subr.mxu0 %v2200_v8 }
 0x616   : > { %2001 = vmatpush3.msra.mxu0 %v1640_v9 }
 0x617   : > { %2002 = vmatprep.subr.mxu0 %v2200_v8 }
 0x618   : > { %2003 = vmatpush3.msra.mxu0 %v1639_v10 }
 0x619   : > { %2004 = vmatprep.subr.mxu0 %v2200_v8 }
 0x61a   : > { %2005 = vmatpush3.msra.mxu0 %v1638_v11 }
 0x61b   : > { %2006 = vmatprep.subr.mxu0 %v2200_v8 }
 0x61c   : > { %2007 = vmatpush3.msra.mxu0 %v1637_v12 }
 0x61d   : > { %2008 = vmatprep.subr.mxu0 %v2200_v8 }
 0x61e   : > { %2009 = vmatpush3.msra.mxu0 %v1636_v13 }
 0x61f   : > { %2010 = vmatprep.subr.mxu0 %v2200_v8 }
 0x620   : > { %2011 = vmatpush3.msra.mxu0 %v1635_v14 }
 0x621   : > { %2012 = vmatprep.subr.mxu0 %v2200_v8 }
 0x622   : > { %2013 = vmatpush3.msra.mxu0 %v1634_v15 }
 0x623   : > { %2014 = vmatprep.subr.mxu0 %v2200_v8 }
 0x624   : > { %2015 = vmatpush3.msra.mxu0 %v1633_v16 }
 0x625   : > { %2016 = vmatprep.subr.mxu0 %v2200_v8 }
 0x626   : > { %2017 = vmatpush3.msra.mxu0 %v1632_v17 }
 0x627   : > { %2018 = vmatprep.subr.mxu0 %v2200_v8 }
 0x628   : > { %2019 = vmatpush3.msra.mxu0 %v1631_v18 }
 0x629   : > { %2020 = vmatprep.subr.mxu0 %v2200_v8 }
 0x62a   : > { %2021 = vmatpush3.msra.mxu0 %v1630_v19 }
 0x62b   : > { %2022 = vmatprep.subr.mxu0 %v2200_v8 }
 0x62c   : > { %2023 = vmatpush3.msra.mxu0 %v1629_v29 }
 0x62d   : > { %2024 = vmatprep.subr.mxu0 %v2200_v8 }
 0x62e   : > { %2025 = vmatpush3.msra.mxu0 %v1628_v30 }
 0x62f   : > { %2026 = vmatprep.subr.mxu0 %v2200_v8 }
 0x630   : > { %2027 = vmatpush3.msra.mxu0 %v1627_v31 }
 0x6d1   : > { %v1500_v55 = vpop.f32.mrf.mxu0 }
 0x6d2   : > { %v1504_v57 = vadd.f32 %v1500_v55, %v2392_v0  ;;  %v1544_v0 = vld [vmem:[%s2700_s10 + $0x10] sm:$0xff] }
 0x6d3   : > { %v1984_v58 = vpop.f32.mrf.mxu0  ;;  %1988 = vmatpush3.msra.mxu1 %v1544_v0 }
 0x6d4   : > { %v2554_v59 = vadd.f32 %v1833_v56, %v1504_v57  ;;  %1989 = vmatprep.subr.mxu1 %v2200_v8 }
 0x6d5   : > { %1990 = vmatpush3.msra.mxu1 %v1543_v4 }
 0x6d6   : > { %v1515_v60 = vsel %vm486_vm0, %v2554_v59, 0.0  ;;  %1991 = vmatprep.subr.mxu1 %v2200_v8 }
 0x6d7   : > { %1516 = vadd.xlane.f32.xlu1 %v1515_v60  ;;  %1992 = vmatpush3.msra.mxu1 %v1542_v5 }
 0x760   : > { %v1517_v61 = vpop.xlane.xlu1 %1516 }
 0x761   : > { %v1518_v62 = vmul.f32 0.03125, %v1517_v61 }
 0x763   : > { %v1519_v63 = vsub.f32 %v2554_v59, %v1518_v62 }
 0x765   : > { %v1520_v1 = vmul.f32 %v1519_v63, %v1519_v63 }
 0x767   : > { %v1521_v2 = vsel %vm486_vm0, %v1520_v1, 0.0 }
 0x768   : > { %1522 = vadd.xlane.f32.xlu0 %v1521_v2 }
 0x7f1   : > { %v1523_v20 = vpop.xlane.xlu0 %1522 }
 0x7f2   : > { %v1524_v21 = vmul.f32 0.03125, %v1523_v20 }
 0x7f4   : > { %v1525_v22 = vadd.f32 1e-05, %v1524_v21 }
 0x7f6   : > { %2103 = vrsqrt.f32 %v1525_v22 }
 0x803   : > { %v2104_v23 = vpop.eup %2103 }
 0x804   : > { %v1527_v25 = vmul.f32 %v2104_v23, %v1519_v63 }
 0x806   : > { %v1534_v27 = vmul.f32 %v1834_v24, %v1527_v25 }
 0x808   : > { %v1541_v28 = vadd.f32 %v1835_v26, %v1534_v27 }
 0x80a   : > { %1994 = vmatmul.mubr.msk.f32.vlgmr.msra.gmra.mxu1 %vm486_vm0, %v1541_v28 }
 0x8ca   : > { %v1622_v33 = vpop.f32.mrf.mxu1 }
 0x8cb   : > { %v1623_v34 = vadd.f32 %v1836_v32, %v1622_v33 }
 0x8cc   : > { %v1995_v35 = vpop.f32.mrf.mxu1 }
 0x8cd   : > { %v1626_v36 = vmax.f32 %v1623_v34, 0.0 }
 0x8cf   : > { %2029 = vmatmul.mubr.f32.vlgmr.msra.gmra.mxu0 %v1626_v36 }
 0x98f   : > { %v1709_v37 = vpop.f32.mrf.mxu0 }
 0x990   : > { %v1713_v8 = vadd.f32 %v1709_v37, %v2554_v59 }
 0x991   : > { %v2030_v39 = vpop.f32.mrf.mxu0 }
 0x992   : > { %v1721_v40 = vadd.f32 %v1838_v38, %v1713_v8 }
 0x994   : > { %1722 = vst.msk [vmem:[%s482_s28] sm:$0xff] %vm486_vm0, %v1721_v40 }
 0x995   : > { %2146 = shalt.err (!%p2143_p10)
}
 0x996   : > { %s2147_s27 = scalar_lea.hbm %s1735_s24, 128  ;;  %s2151_s22 = scalar_lea.hbm %s2729_s19, 256 }
 0x997   : > { %p2148_p2 = scmp.ne.s32.totalorder %s1735_s24, %s2147_s27  ;;  %p2152_p7 = scmp.lt.s32.totalorder %s1735_s24, %s2729_s19 }
 0x998   : > { %p2153_p0 = scmp.lt.s32.totalorder %s2151_s22, %s2147_s27 }
 0x999   : > { %p2149_p4 = pnand %p2148_p2, %p2730_p12 }
 0x99a   : > { %p2154_p6 = por %p2153_p0, %p2152_p7 }
 0x99b   : > { %p2150_p9 = pneg %p2149_p4 }
 0x99d   : > { %p2155_p11 = pnand %p2154_p6, %p2150_p9 }
 0x99f   : > { %2158 = shalt.err (!%p2155_p11)
}
 0x9a0   : > { %2033 = dma.vmem_to_hbm [thread:$0]  (%p2730_p12), %s1738_s14, 128, %s1735_s24, %s1724_s23  }
 0x9a1 PF: > { %s2731_s15 = sld [smem:[#allocation8_spill]]  ;;  %p2734_p1 = scmp.ge.s32.totalorder %s2197_s16, 2 }
 0x9a2   : > { %s2732_s20 = sld [smem:[#allocation12_spill]] }
 0x9a7   : > { %s1749_s17 = sand.u32 1, %s2731_s15  }
 0x9a8   : > { %p2733_p13 = scmp.ne.s32.totalorder %s2732_s20, 0  ;;  %s1750_s13 = scalar_lea.sflag [#allocation4], %s1749_s17 }
 0x9aa   : > { %p2040_p3 = pnand %p2734_p1, %p2733_p13 }
 0x9ac   : > { %p2041_p5 = pneg %p2040_p3 }
 0x9ae   : > { %2180 = dma.done.wait (%p2041_p5), %s1750_s13, 128  }
 0x9af   : > { %2182 = vsyncadd (%p2041_p5), %s1750_s13, 4294967168  ;;  %s2735_s16 = sld [smem:[#allocation10_spill]]  ;;  %s2738_s29 = smov %s2189_s30 }
 0x9b0   : > { %s2736_s21 = sld [smem:[#allocation9_spill]] }
 0x9b1   : > { %s2737_s15 = sld [smem:[#allocation11_spill]] }
 0x9b5   : > { %p27_p8 = scmp.ge.s32.totalorder %s2735_s16, 4  }
 0x9b6   : > { %s2739_s30 = smov %s2736_s21 }
 0x9b7   :  { %29 = sbr.rel (!%p27_p8) target bundleno = 8 (0x8), region = 121 }
 0x9bc   :  { %1755 = vsyncpa [#allocation3], 1 }
 0x9bd   :  { %1757 = vsyncpa [#allocation3 + $0x1], 1 }
 0x9be   :  { %1758 = vsyncpa [#allocation4], 1 }
 0x9bf   :  { %1760 = vsyncpa [#allocation4 + $0x1], 1 }

</bundles_post_ra>
